<compile_context>
chip_gen: v5e
topology: v5e:2x2
jax: 0.10.0
libtpu: 0.0.40
codegen_flags: <defaults>
</compile_context>

<pallas_src>
import numpy as np
import jax
import jax.numpy as jnp
from jax import lax
from jax.experimental import pallas as pl
from jax.experimental.pallas import tpu as pltpu


def _round_up(a, b):
    return ((a + b - 1) // b) * b


# ----------------------------------------------------------------------------
# Host-side constants derived from the irreps (fuses the per-irrep loop).
# ----------------------------------------------------------------------------
def _build_irrep_constants(irreps, bias):
    dim = sum(mul * (2 * l + 1) for mul, l in irreps)
    nfeat = sum(mul for mul, _l in irreps)
    a = np.zeros((dim, nfeat), np.float32)      # component averaging:  (x*x) @ a -> (., F)
    e = np.zeros((nfeat, dim), np.float32)      # per-feature -> per-component expansion
    smask_f = np.zeros((1, nfeat), np.float32)  # 1 where feature is a scalar (l == 0)
    smask_d = np.zeros((1, dim), np.float32)
    bias_d = np.zeros((1, dim), np.float32)     # bias scattered to scalar columns of D
    bias = np.asarray(bias, np.float32).reshape(-1)
    ix = iw = ib = 0
    for mul, l in irreps:
        d = 2 * l + 1
        for m in range(mul):
            f = iw + m
            c0 = ix + m * d
            a[c0:c0 + d, f] = 1.0 / d
            e[f, c0:c0 + d] = 1.0
            if l == 0:
                smask_f[0, f] = 1.0
                smask_d[0, c0] = 1.0
                bias_d[0, c0] = bias[ib + m]
        if l == 0:
            ib += mul
        iw += mul
        ix += mul * d
    return a, e, smask_f, smask_d, bias_d


# ----------------------------------------------------------------------------
# Phase 1: per-graph raw sums (node-tile reduction). Only x + batch ids are streamed.
# ----------------------------------------------------------------------------
def _stats_kernel(x_ref, bid_ref, sum_ref, sq_ref):
    t = pl.program_id(0)

    @pl.when(t == 0)
    def _():
        sum_ref[...] = jnp.zeros_like(sum_ref)
        sq_ref[...] = jnp.zeros_like(sq_ref)

    xf = x_ref[...].astype(jnp.float32)                       # (tile, D) in-kernel upcast
    bid = bid_ref[...]                                        # (1, tile) int32 (-1 = padded node)
    b_pad, tile = sum_ref.shape[0], bid.shape[1]
    gid = lax.broadcasted_iota(jnp.int32, (b_pad, tile), 0)
    onehot = (gid == bid).astype(jnp.float32)                 # (B, tile) built on VPU, never in HBM
    sum_ref[...] += jnp.dot(onehot, xf, preferred_element_type=jnp.float32)
    sq_ref[...] += jnp.dot(onehot, xf * xf, preferred_element_type=jnp.float32)


# ----------------------------------------------------------------------------
# Phase 2: apply normalization (node-tile parallel).
# ----------------------------------------------------------------------------
def _apply_kernel(x_ref, bid_ref, mean_ref, scale_ref, bias_ref, o_ref):
    xf = x_ref[...].astype(jnp.float32)                       # (tile, D)
    bid = bid_ref[...]                                        # (tile, 1) int32
    tile, b_pad = bid.shape[0], mean_ref.shape[0]
    gid = lax.broadcasted_iota(jnp.int32, (tile, b_pad), 1)
    onehot_t = (gid == bid).astype(jnp.float32)               # (tile, B): transpose-free gather layout
    node_mean = jnp.dot(onehot_t, mean_ref[...], preferred_element_type=jnp.float32)   # (tile, D)
    node_scale = jnp.dot(onehot_t, scale_ref[...], preferred_element_type=jnp.float32)  # (tile, D)
    out = (xf - node_mean) * node_scale + bias_ref[...]
    o_ref[...] = out.astype(o_ref.dtype)                      # single full-width store


# ----------------------------------------------------------------------------
# Tiling heuristic: big node tiles, bounded per-step VMEM (fits v5e/v6e/v7x).
# ----------------------------------------------------------------------------
def _choose_tile(dim, itemsize, b_pad):
    target = (2 << 20) // max(dim * itemsize, 1)               # ~2 MiB of native x per block
    vmem_cap = (16 << 20) // max(32 * dim + 8 * b_pad, 1)      # keep per-step VMEM ~<=16 MiB
    t = min(target, vmem_cap, 32768)
    return max((t // 128) * 128, 128)


# ----------------------------------------------------------------------------
# Wrapper
# ----------------------------------------------------------------------------
def instance_norm_pallas(x, batch, weight, bias, num_graphs, irreps, eps=1e-5,
                         tile_n=None):
    """InstanceNorm forward; x: (N, irreps_dim), batch: (N,) int32."""
    irreps = tuple(irreps)
    n, dim = x.shape
    num_scalar = sum(mul for mul, l in irreps if l == 0)
    num_features = sum(mul for mul, _l in irreps)
    assert weight.shape[-1] == num_features
    assert bias.shape[-1] == num_scalar, "bias must have one entry per scalar feature"

    a_np, e_np, smf_np, smd_np, biasd_np = _build_irrep_constants(irreps, bias)
    a_m = jnp.asarray(a_np)
    e_m = jnp.asarray(e_np)
    smf = jnp.asarray(smf_np)
    smd = jnp.asarray(smd_np)
    bias_d = jnp.asarray(biasd_np)
    w_f = jnp.asarray(weight, jnp.float32).reshape(1, num_features)

    b_pad = _round_up(max(int(num_graphs), 8), 8)              # sublane-aligned graph dim

    # ----- padding / tiling -----
    tile_rows = _choose_tile(dim, x.dtype.itemsize, b_pad) if tile_n is None else int(tile_n)
    if n <= tile_rows:
        n_pad = _round_up(max(n, 8), 8)
        tile = n_pad                                           # single tile == full extent
    else:
        tile = tile_rows
        assert tile % 128 == 0, "node tile must be a multiple of 128"
        n_pad = _round_up(n, tile)
    num_tiles = n_pad // tile

    # x stays in native dtype (upcast happens per-tile in-kernel); pad only if needed.
    xp = x if n_pad == n else jnp.pad(x, ((0, n_pad - n), (0, 0)))
    batch_pad = jnp.pad(batch.astype(jnp.int32), (0, n_pad - n), constant_values=-1)
    batch_row = batch_pad.reshape(1, n_pad)                    # phase 1: ids along lanes
    batch_col = batch_pad.reshape(n_pad, 1)                    # phase 2: ids along sublanes

    vmem_limit = 32 * 1024 * 1024                              # explicit; tile cap keeps usage well below

    # ----- phase 1: per-graph raw sums (reduction over node tiles) -----
    sum_x, sum_sq = pl.pallas_call(
        _stats_kernel,
        grid=(num_tiles,),
        in_specs=[
            pl.BlockSpec((tile, dim), lambda i: (i, 0)),       # x (native dtype)
            pl.BlockSpec((1, tile), lambda i: (0, i)),         # batch ids (lane-major)
        ],
        out_specs=[
            pl.BlockSpec((b_pad, dim), lambda i: (0, 0)),      # sum(x) per graph (resident acc)
            pl.BlockSpec((b_pad, dim), lambda i: (0, 0)),      # sum(x*x) per graph (resident acc)
        ],
        out_shape=[
            jax.ShapeDtypeStruct((b_pad, dim), jnp.float32),
            jax.ShapeDtypeStruct((b_pad, dim), jnp.float32),
        ],
        compiler_params=pltpu.CompilerParams(
            dimension_semantics=("arbitrary",), vmem_limit_bytes=vmem_limit),
    )(xp, batch_row)

    # ----- finalize: tiny (B, F)/(B, D) math, plain XLA (keeps A/E/weight out of the hot loop) -----
    counts = jax.ops.segment_sum(jnp.ones((n,), jnp.float32),
                                 batch.astype(jnp.int32), num_segments=b_pad)
    inv_counts = (1.0 / jnp.maximum(counts, 1.0)).reshape(b_pad, 1)   # guard empty/padded graphs
    seg_mean = sum_x * inv_counts                                     # (B, D)
    mean_f = seg_mean @ a_m                                           # (B, F)
    mean_sq_f = (sum_sq * inv_counts) @ a_m                           # (B, F)
    # scalars (l==0): var = E[x^2] - mean^2 ; l>0: component mean of x^2 (no centering).
    # clamp >= 0 to guard one-pass f32 cancellation for large-|mean| scalar channels.
    seg_norm = jnp.maximum(mean_sq_f - smf * (mean_f * mean_f), 0.0)
    inv_norm = lax.rsqrt(seg_norm + float(eps)) * w_f                 # (B, F)
    seg_scale = inv_norm @ e_m                                        # (B, D)
    seg_mean_c = seg_mean * smd                                       # only scalar cols are centered

    # ----- phase 2: apply normalization (parallel over node tiles) -----
    out = pl.pallas_call(
        _apply_kernel,
        grid=(num_tiles,),
        in_specs=[
            pl.BlockSpec((tile, dim), lambda i: (i, 0)),       # x (native dtype)
            pl.BlockSpec((tile, 1), lambda i: (i, 0)),         # batch ids (sublane-major)
            pl.BlockSpec((b_pad, dim), lambda i: (0, 0)),      # seg_mean (scalar cols)
            pl.BlockSpec((b_pad, dim), lambda i: (0, 0)),      # seg_scale (all cols)
            pl.BlockSpec((1, dim), lambda i: (0, 0)),          # bias scattered to D
        ],
        out_specs=pl.BlockSpec((tile, dim), lambda i: (i, 0)),
        out_shape=jax.ShapeDtypeStruct((n_pad, dim), x.dtype),
        compiler_params=pltpu.CompilerParams(
            dimension_semantics=("parallel",), vmem_limit_bytes=vmem_limit),
    )(xp, batch_col, seg_mean_c, seg_scale, bias_d)

    return out[:n]


# ----------------------------------------------------------------------------
# NormalizationLayer wrapper
# ----------------------------------------------------------------------------
class NormalizationLayerPallas:
    def __init__(self, irreps, method="instance"):
        assert method in ("batch", "instance", "none", None)
        self.method = method
        self.irreps = tuple(irreps)
        num_features = sum(mul for mul, _l in self.irreps)
        num_scalar = sum(mul for mul, l in self.irreps if l == 0)
        # deterministic synthetic parameters (module init is ones/zeros; perturb to
        # exercise the affine path)
        self.weight = 1.0 + 0.05 * jnp.arange(num_features, dtype=jnp.float32)
        self.bias = 0.01 * jnp.arange(num_scalar, dtype=jnp.float32)
        # TODO(synk): method == "batch" (e3nn BatchNorm with running stats) not implemented.

    def __call__(self, x, batch, num_graphs, tile_n=None):
        if self.method in ("none", None):
            return x
        assert self.method == "instance"
        return instance_norm_pallas(
            x, batch, self.weight, self.bias, num_graphs, self.irreps, tile_n=tile_n
        )


# ----------------------------------------------------------------------------
# Pure-JAX reference (mirrors the PyTorch InstanceNorm.forward)
# ----------------------------------------------------------------------------
def instance_norm_ref(x, batch, weight, bias, num_graphs, irreps, eps=1e-5):
    counts = jax.ops.segment_sum(
        jnp.ones((x.shape[0],), jnp.float32), batch, num_segments=num_graphs
    )
    fields = []
    ix, iw, ib = 0, 0, 0
    for mul, l in irreps:
        d = 2 * l + 1
        field = x[:, ix: ix + mul * d].reshape(-1, mul, d)
        ix += mul * d
        if l == 0:
            seg_mean = (
                jax.ops.segment_sum(field, batch, num_segments=num_graphs)
                / counts[:, None, None]
            )
            field = field - seg_mean[batch]
        field_norm = (field ** 2).mean(-1)                       # component
        seg_norm = (
            jax.ops.segment_sum(field_norm, batch, num_segments=num_graphs)
            / counts[:, None]
        )                                                        # reduce='mean'
        seg_norm = (seg_norm + eps) ** -0.5
        seg_norm = seg_norm * weight[None, iw: iw + mul]
        iw += mul
        field = field * seg_norm[batch][:, :, None]
        if d == 1:
            field = field + bias[ib: ib + mul].reshape(mul, 1)
            ib += mul
        fields.append(field.reshape(-1, mul * d))
    return jnp.concatenate(fields, axis=-1)


# ----------------------------------------------------------------------------
if __name__ == "__main__":
    # --- test 1: single-tile path.  irreps = "4x0e + 2x1o" -> dim = 4 + 6 = 10 ---
    irreps = ((4, 0), (2, 1))
    dim = sum(mul * (2 * l + 1) for mul, l in irreps)
    num_nodes, num_graphs = 16, 2

    key = jax.random.PRNGKey(0)
    k1, k2 = jax.random.split(key)
    x = jax.random.normal(k1, (num_nodes, dim), dtype=jnp.float32)
    batch = jnp.array([0] * 9 + [1] * 7, dtype=jnp.int32)

    layer = NormalizationLayerPallas(irreps, method="instance")
    out = jax.block_until_ready(layer(x, batch, num_graphs))
    ref = instance_norm_ref(x, batch, layer.weight, layer.bias, num_graphs, irreps)
    assert out.shape == (num_nodes, dim)
    assert jnp.allclose(out, ref, rtol=1e-4, atol=1e-4), (
        f"max abs diff = {jnp.max(jnp.abs(out - ref))}"
    )

    # --- test 2: multi-tile path with a ragged tail (accumulation + in-kernel masking) ---
    irreps2 = ((8, 0), (4, 1), (2, 2))                # dim = 8 + 12 + 10 = 30
    dim2 = sum(mul * (2 * l + 1) for mul, l in irreps2)
    n2, g2 = 250, 3
    x2 = jax.random.normal(k2, (n2, dim2), dtype=jnp.float32)
    batch2 = jnp.asarray(np.repeat(np.arange(3), [90, 80, 80]).astype(np.int32))
    layer2 = NormalizationLayerPallas(irreps2, method="instance")
    out2 = jax.block_until_ready(layer2(x2, batch2, g2, tile_n=128))   # force multi-tile
    ref2 = instance_norm_ref(x2, batch2, layer2.weight, layer2.bias, g2, irreps2)
    assert out2.shape == (n2, dim2)
    assert jnp.allclose(out2, ref2, rtol=1e-4, atol=1e-4), (
        f"max abs diff = {jnp.max(jnp.abs(out2 - ref2))}"
    )

    print("KERNEL_OK")
</pallas_src>

<mosaic_0001>
module attributes {stable_mosaic.version = 11 : i64} {
  func.func @_stats_kernel(%arg0: i32, %arg1: memref<16x10xf32, #tpu.memory_space<vmem>>, %arg2: memref<1x16xi32, #tpu.memory_space<vmem>>, %arg3: memref<8x10xf32, #tpu.memory_space<vmem>>, %arg4: memref<8x10xf32, #tpu.memory_space<vmem>>) attributes {dimension_semantics = [#tpu.dimension_semantics<arbitrary>], iteration_bounds = array<i64: 1>, scalar_prefetch = 0 : i64, scratch_operands = 0 : i64, tpu.core_type = #tpu.core_type<tc>, window_params = [{transform_indices = @transform_0, window_bounds = array<i64: 16, 10>}, {transform_indices = @transform_1, window_bounds = array<i64: 1, 16>}, {pipeline_mode = #tpu.pipeline_mode<synchronous>, transform_indices = @transform_2, window_bounds = array<i64: 8, 10>}, {pipeline_mode = #tpu.pipeline_mode<synchronous>, transform_indices = @transform_3, window_bounds = array<i64: 8, 10>}]} {
    %c0_i32 = arith.constant 0 : i32
    %0 = arith.cmpi eq, %arg0, %c0_i32 : i32
    %1 = arith.extui %0 : i1 to i32
    %c0_i32_0 = arith.constant 0 : i32
    %2 = arith.cmpi ne, %1, %c0_i32_0 : i32
    scf.if %2 {
      %cst_13 = arith.constant 0.000000e+00 : f32
      %19 = vector.broadcast %cst_13 : f32 to vector<8x10xf32>
      %c0_14 = arith.constant 0 : index
      %c0_15 = arith.constant 0 : index
      %20 = vector.load %arg3[%c0_14, %c0_15] : memref<8x10xf32, #tpu.memory_space<vmem>>, vector<8x10xf32>
      tpu.vector_store %arg3[%c0_14, %c0_15], %19 {strides = array<i32>} : memref<8x10xf32, #tpu.memory_space<vmem>>, vector<8x10xf32>,
      %cst_16 = arith.constant 0.000000e+00 : f32
      %21 = vector.broadcast %cst_16 : f32 to vector<8x10xf32>
      %c0_17 = arith.constant 0 : index
      %c0_18 = arith.constant 0 : index
      %22 = vector.load %arg4[%c0_17, %c0_18] : memref<8x10xf32, #tpu.memory_space<vmem>>, vector<8x10xf32>
      tpu.vector_store %arg4[%c0_17, %c0_18], %21 {strides = array<i32>} : memref<8x10xf32, #tpu.memory_space<vmem>>, vector<8x10xf32>,
    } else {
    }
    %c0 = arith.constant 0 : index
    %c0_1 = arith.constant 0 : index
    %3 = vector.load %arg1[%c0, %c0_1] : memref<16x10xf32, #tpu.memory_space<vmem>>, vector<16x10xf32>
    %c0_2 = arith.constant 0 : index
    %c0_3 = arith.constant 0 : index
    %4 = vector.load %arg2[%c0_2, %c0_3] : memref<1x16xi32, #tpu.memory_space<vmem>>, vector<1x16xi32>
    %5 = tpu.iota {dimensions = array<i32: 0>} : vector<8x16xi32>
    %6 = vector.broadcast %4 : vector<1x16xi32> to vector<8x16xi32>
    %7 = arith.cmpi eq, %5, %6 : vector<8x16xi32>
    %8 = arith.extui %7 : vector<8x16xi1> to vector<8x16xi32>
    %9 = arith.sitofp %8 : vector<8x16xi32> to vector<8x16xf32>
    %c0_4 = arith.constant 0 : index
    %c0_5 = arith.constant 0 : index
    %10 = vector.load %arg3[%c0_4, %c0_5] : memref<8x10xf32, #tpu.memory_space<vmem>>, vector<8x10xf32>
    %cst = arith.constant dense<0.000000e+00> : vector<8x10xf32>
    %11 = tpu.matmul %9, %3, %cst {dimension_numbers = #tpu.dot_dimension_numbers<[1], [0], [0], [1], [0, 0, 1, 1], [], []>} : vector<8x16xf32>, vector<16x10xf32>, vector<8x10xf32> -> vector<8x10xf32>
    %12 = arith.addf %10, %11 : vector<8x10xf32>
    %c0_6 = arith.constant 0 : index
    %c0_7 = arith.constant 0 : index
    %13 = vector.load %arg3[%c0_6, %c0_7] : memref<8x10xf32, #tpu.memory_space<vmem>>, vector<8x10xf32>
    tpu.vector_store %arg3[%c0_6, %c0_7], %12 {strides = array<i32>} : memref<8x10xf32, #tpu.memory_space<vmem>>, vector<8x10xf32>,
    %c0_8 = arith.constant 0 : index
    %c0_9 = arith.constant 0 : index
    %14 = vector.load %arg4[%c0_8, %c0_9] : memref<8x10xf32, #tpu.memory_space<vmem>>, vector<8x10xf32>
    %15 = arith.mulf %3, %3 : vector<16x10xf32>
    %cst_10 = arith.constant dense<0.000000e+00> : vector<8x10xf32>
    %16 = tpu.matmul %9, %15, %cst_10 {dimension_numbers = #tpu.dot_dimension_numbers<[1], [0], [0], [1], [0, 0, 1, 1], [], []>} : vector<8x16xf32>, vector<16x10xf32>, vector<8x10xf32> -> vector<8x10xf32>
    %17 = arith.addf %14, %16 : vector<8x10xf32>
    %c0_11 = arith.constant 0 : index
    %c0_12 = arith.constant 0 : index
    %18 = vector.load %arg4[%c0_11, %c0_12] : memref<8x10xf32, #tpu.memory_space<vmem>>, vector<8x10xf32>
    tpu.vector_store %arg4[%c0_11, %c0_12], %17 {strides = array<i32>} : memref<8x10xf32, #tpu.memory_space<vmem>>, vector<8x10xf32>,
    return
  }
  func.func @transform_0(%arg0: i32) -> (i32, i32) {
    %c0_i32 = arith.constant 0 : i32
    %c0_i32_0 = arith.constant 0 : i32
    return %arg0, %c0_i32 : i32, i32
  }
  func.func @transform_1(%arg0: i32) -> (i32, i32) {
    %c0_i32 = arith.constant 0 : i32
    %c0_i32_0 = arith.constant 0 : i32
    return %c0_i32, %arg0 : i32, i32
  }
  func.func @transform_2(%arg0: i32) -> (i32, i32) {
    %c0_i32 = arith.constant 0 : i32
    %c0_i32_0 = arith.constant 0 : i32
    %c0_i32_1 = arith.constant 0 : i32
    return %c0_i32, %c0_i32_0 : i32, i32
  }
  func.func @transform_3(%arg0: i32) -> (i32, i32) {
    %c0_i32 = arith.constant 0 : i32
    %c0_i32_0 = arith.constant 0 : i32
    %c0_i32_1 = arith.constant 0 : i32
    return %c0_i32, %c0_i32_0 : i32, i32
  }
}

</mosaic_0001>

<bundles_post_ra>
// kernel: tpu_custom_call.1
= control target key start
LH: loop header
LB: loop body
LE: loop exit
PB: predicated region body
PF: predicated region fallthrough
CT: control target
= control target key end

     0   :  { %9 = vsyncpa [#allocation3], 0  ;;  %s306_s0 = inlined_call_operand.hbm [shape: f32[16,10], index: 0, kind: input, shape index: {}]   ;;  %s307_s1 = inlined_call_operand.hbm [shape: s32[1,16], index: 1, kind: input, shape index: {}]   ;;  %s308_s2 = inlined_call_operand.hbm [shape: f32[8,10], index: 2, kind: output, shape index: {0}]   ;;  %s309_s3 = inlined_call_operand.hbm [shape: f32[8,10], index: 3, kind: output, shape index: {1}]  }
   0x1   :  { %10 = vsyncpa [#allocation6], 0 }
   0x2   :  { %11 = vsyncpa [#allocation4], 0 }
   0x3   :  { %12 = vsyncpa [#allocation9], 0  ;;  %s17_s14 = sshll.u32 %s306_s0, 4  ;;  %s263_s15 = smov [#allocation2]   ;;  %s18_s14 = int_to_ptr.hbm [resolvable:$true] %s17_s14 }
   0x4   :  { %s19_s16 = sshll.u32 %s263_s15, 4  ;;  %s31_s19 = sshll.u32 %s307_s1, 4  ;;  %s20_s16 = int_to_ptr.vmem [resolvable:$true] %s19_s16  ;;  %s32_s19 = int_to_ptr.hbm [resolvable:$true] %s31_s19 }
   0x5   :  { %s264_s20 = smov 128   ;;  %s265_s21 = smov 8  }
   0x6   :  { %25 = dma.hbm_to_vmem [thread:$0]  %s18_s14, 256, %s20_s16, [#allocation3], %s264_s20, %s264_s20, %s265_s21  }
   0x7   :  { %s266_s22 = smov [#allocation5]  }
   0x8   :  { %s33_s23 = sshll.u32 %s266_s22, 4  ;;  %s34_s23 = int_to_ptr.vmem [resolvable:$true] %s33_s23 }
   0x9   :  { %36 = dma.hbm_to_vmem [thread:$0]  %s32_s19, 16, %s34_s23, [#allocation6]  }
   0xa   :  { %255 = dma.done.wait [#allocation3], 256  }
   0xb   :  { %256 = vsyncadd [#allocation3], 4294967040 }
   0xc   :  { %257 = dma.done.wait [#allocation6], 16  }
   0xd   :  { %258 = vsyncadd [#allocation6], 4294967280  ;;  %vm49_vm0 = vcmask 80896   ;;  %v267_v0 = vmov 0.0   ;;  %v55_v1 = vlaneseq  ;;  %v53_v3 = vld [vmem:[#allocation2 + $0x8] sm:$0xff]  ;;  %v52_v4 = vld [vmem:[#allocation2] sm:$0xff] }
   0xe   :  { %50 = vst.msk [vmem:[#allocation7] sm:$0xff] %vm49_vm0, %v267_v0  ;;  %80 = vmatpush.msra.mxu0 %v53_v3  ;;  %v91_v5 = vmul.f32 %v53_v3, %v53_v3  ;;  %v90_v6 = vmul.f32 %v52_v4, %v52_v4  ;;  %v158_v7 = vld [vmem:[#allocation5] ss:$0 sm:$0xff]  ;;  %vm62_vm1 = vcmask 130048   ;;  %s268_s0 = smov [#allocation7]   ;;  %s121_s26 = sshll.u32 %s308_s2, 4  ;;  %s122_s26 = int_to_ptr.hbm [resolvable:$true] %s121_s26 }
   0xf   :  { %51 = vst.msk [vmem:[#allocation8] sm:$0xff] %vm49_vm0, %v267_v0  ;;  %v56_v2 = vshrl.u32 %v55_v1, 7  ;;  %s119_s1 = sshll.u32 %s268_s0, 4  ;;  %s269_s27 = smov [#allocation8]   ;;  %s120_s1 = int_to_ptr.vmem [resolvable:$true] %s119_s1 }
  0x10   :  { %106 = vmatpush.msra.mxu1 %v91_v5  ;;  %81 = vmatpush.msra.mxu0 %v52_v4  ;;  %s130_s28 = sshll.u32 %s269_s27, 4  ;;  %s132_s4 = sshll.u32 %s309_s3, 4  ;;  %s131_s28 = int_to_ptr.vmem [resolvable:$true] %s130_s28  ;;  %s133_s4 = int_to_ptr.hbm [resolvable:$true] %s132_s4 }
  0x11   :  { %vm58_vm2 = vcmp.eq.s32.totalorder %v56_v2, %v158_v7 }
  0x12   :  { %v148_v8 = vsel %vm58_vm2, 1.0, %v267_v0  ;;  %107 = vmatpush.msra.mxu1 %v90_v6 }
  0x13   :  { %149 = vmatmul.msk.f32.vlgmr.msra.gmra.mxu0 %vm62_vm1, %v148_v8  ;;  %150 = vmatmul.msk.f32.vlgmr.msra.gmra.mxu1 %vm62_vm1, %v148_v8 }
  0x15   :  { %v61_v9 = vld [vmem:[#allocation7] sm:$0xff] }
  0x16   :  { %v89_v10 = vld [vmem:[#allocation8] sm:$0xff] }
  0x90   :  { %v83_v11 = vpop.f32.mrf.mxu0  ;;  %v109_v13 = vpop.f32.mrf.mxu1 }
  0x91   :  { %v86_v12 = vadd.f32 %v83_v11, %v61_v9  ;;  %v112_v14 = vadd.f32 %v109_v13, %v89_v10 }
  0x93   :  { %88 = vst.msk [vmem:[#allocation7] sm:$0xff] %vm49_vm0, %v86_v12 }
  0x94   :  { %113 = vst.msk [vmem:[#allocation8] sm:$0xff] %vm49_vm0, %v112_v14  ;;  %124 = dma.vmem_to_hbm [thread:$0]  %s120_s1, 128, %s122_s26, [#allocation4]  }
  0x95   :  { %135 = dma.vmem_to_hbm [thread:$0]  %s131_s28, 128, %s133_s4, [#allocation9]  }
  0x96   :  { %259 = dma.done.wait [#allocation4], 128  }
  0x97   :  { %260 = vsyncadd [#allocation4], 4294967168 }
  0x98   :  { %261 = dma.done.wait [#allocation9], 128  }
  0x99   :  { %262 = vsyncadd [#allocation9], 4294967168 }
  0x9a   :  { %144 = vsyncpa [#allocation3], 1 }
  0x9b   :  { %145 = vsyncpa [#allocation6], 1 }
  0x9c   :  { %146 = vsyncpa [#allocation4], 1 }
  0x9d   :  { %147 = vsyncpa [#allocation9], 1 }

</bundles_post_ra>
